<compile_context>
chip_gen: v7x
topology: tpu7x:2x2x1
jax: 0.10.0
libtpu: 0.0.40
codegen_flags: <defaults>
</compile_context>

<pallas_src>
import functools

import jax
import jax.numpy as jnp
from jax import lax
from jax.experimental import pallas as pl
from jax.experimental.pallas import tpu as pltpu


# ----------------------------- Pallas kernel ------------------------------ #
def _downskip_kernel(Hp, Wp, xp_ref, w1_ref, b1_ref, w2_ref, b2_ref,
                     o_ref, pat_ref):
    # xp_ref : (Cin, L)        pooled input, L = Nb*Hp*Wp lanes, f32
    # w1_ref : (Cc, 9*Cin)     bf16      b1_ref: (Cc, 1) f32
    # w2_ref : (Cc, 9*Cc)      bf16      b2_ref: (Cc, 1) f32
    # o_ref  : (Cin+Cc, L)     f32  ->  [ pooled input ; DoubleConv output ]
    # pat_ref: (9*max(Cin,Cc), L) f32 scratch, reused by both convs
    f32 = jnp.float32
    Cin = xp_ref.shape[0]
    Cc = w1_ref.shape[0]
    L = xp_ref.shape[1]
    HW = Hp * Wp

    def _roll(v, s):
        # tap[f] = v[f + s]  ==  roll by -s; normalize to a non-negative shift.
        return pltpu.roll(v, (-s) % L, axis=1)

    # Border-validity masks from iota.  h/w are taken per-sample (mod HW / Wp),
    # so vertical taps cannot leak across the Nb samples packed along lanes.
    lane = lax.broadcasted_iota(jnp.int32, (1, L), 1)
    col = lane % Wp                       # within-row column
    off = lane % HW                       # within-sample flat offset
    m_l = (col >= 1).astype(f32)          # tap at w-1 valid
    m_r = (col <= Wp - 2).astype(f32)     # tap at w+1 valid
    m_t = (off >= Wp).astype(f32)         # tap at h-1 valid
    m_b = (off < HW - Wp).astype(f32)     # tap at h+1 valid

    def im2col(u, C):
        # Writes the 9 taps of a 3x3 / pad=1 conv of u (C, L) into pat_ref
        # rows [0, 9*C).  Row block (ky*3 + kx)*C holds u shifted by
        # (ky-1, kx-1), zero outside the (per-sample) image.
        ml = jnp.broadcast_to(m_l, (C, L))
        mr = jnp.broadcast_to(m_r, (C, L))
        mt = jnp.broadcast_to(m_t, (C, L))
        mb = jnp.broadcast_to(m_b, (C, L))
        # 3 masked horizontal bases; vertical +-Wp rolls of those give all 9
        # taps.  Horizontal masks commute with the vertical rolls because L is
        # a multiple of Wp.
        bases = (_roll(u, -1) * ml, u, _roll(u, +1) * mr)
        for kx in range(3):
            b = bases[kx]
            pat_ref[pl.ds((0 * 3 + kx) * C, C), :] = _roll(b, -Wp) * mt
            pat_ref[pl.ds((1 * 3 + kx) * C, C), :] = b
            pat_ref[pl.ds((2 * 3 + kx) * C, C), :] = _roll(b, +Wp) * mb

    xp = xp_ref[...]                                             # (Cin, L) f32

    # conv1: ONE MXU matmul, K = 9*Cin, lane dim L; bf16 operands, f32 accum.
    im2col(xp, Cin)
    p1 = pat_ref[pl.ds(0, 9 * Cin), :].astype(jnp.bfloat16)
    h1 = jnp.dot(w1_ref[...], p1, preferred_element_type=f32)
    h1 = jnp.maximum(h1 + b1_ref[...], 0.0)                      # (Cc, L) f32

    # conv2: same scheme on the intermediate (scratch reused).
    im2col(h1, Cc)
    p2 = pat_ref[pl.ds(0, 9 * Cc), :].astype(jnp.bfloat16)
    h2 = jnp.dot(w2_ref[...], p2, preferred_element_type=f32)
    h2 = jnp.maximum(h2 + b2_ref[...], 0.0)                      # (Cc, L) f32

    # Fused channel concat: [xp ; h2] -> lane-dense, unmasked stores.
    o_ref[0:Cin, :] = xp.astype(o_ref.dtype)
    o_ref[Cin:Cin + Cc, :] = h2.astype(o_ref.dtype)


def _downskip_pallas(xp_lanes, w1r, b1r, w2r, b2r, Hp, Wp, Nb):
    Cin, total = xp_lanes.shape
    Cc = w1r.shape[0]
    Ctot = Cin + Cc
    HW = Hp * Wp
    L = Nb * HW
    G = total // L
    Cmax = max(Cin, Cc)

    grid_spec = pltpu.PrefetchScalarGridSpec(
        num_scalar_prefetch=0,
        grid=(G,),
        in_specs=[
            pl.BlockSpec((Cin, L), lambda g: (0, g)),
            pl.BlockSpec((Cc, 9 * Cin), lambda g: (0, 0)),
            pl.BlockSpec((Cc, 1), lambda g: (0, 0)),
            pl.BlockSpec((Cc, 9 * Cc), lambda g: (0, 0)),
            pl.BlockSpec((Cc, 1), lambda g: (0, 0)),
        ],
        out_specs=pl.BlockSpec((Ctot, L), lambda g: (0, g)),
        scratch_shapes=[pltpu.VMEM((9 * Cmax, L), jnp.float32)],
    )
    return pl.pallas_call(
        functools.partial(_downskip_kernel, Hp, Wp),
        out_shape=jax.ShapeDtypeStruct((Ctot, total), xp_lanes.dtype),
        grid_spec=grid_spec,
        compiler_params=pltpu.CompilerParams(
            dimension_semantics=("parallel",)),
    )(xp_lanes, w1r, b1r, w2r, b2r)


# ------------------------------ JAX wrapper -------------------------------- #
def downskip_forward(x_nchw, params, samples_per_step=None):
    """DownSkip.forward: maxpool(2) -> DoubleConv(relu, no dropout) -> cat."""
    N, Cin, H, W = x_nchw.shape
    assert H % 2 == 0 and W % 2 == 0, "MaxPool2d(2) needs even H and W"
    Hp, Wp = H // 2, W // 2
    HW = Hp * Wp
    assert Hp >= 2 and Wp >= 2

    # MaxPool2d(2) + lane-major relayout; XLA fuses these into one pass.
    xp = x_nchw.reshape(N, Cin, Hp, 2, Wp, 2).max(axis=(3, 5))   # (N,Cin,Hp,Wp)
    xp_lanes = xp.reshape(N, Cin, HW).transpose(1, 0, 2).reshape(Cin, N * HW)

    w1, b1, w2, b2 = params["w1"], params["b1"], params["w2"], params["b2"]
    Cc = w1.shape[3]
    # im2col weight layout: rows = out channel, cols = (ky*3 + kx)*Cin + cin.
    # Cast to bf16 for the MXU (biases / epilogue stay f32).
    w1r = jnp.transpose(w1, (3, 0, 1, 2)).reshape(Cc, 9 * Cin).astype(jnp.bfloat16)
    w2r = jnp.transpose(w2, (3, 0, 1, 2)).reshape(Cc, 9 * Cc).astype(jnp.bfloat16)
    b1r = b1.reshape(Cc, 1).astype(jnp.float32)
    b2r = b2.reshape(Cc, 1).astype(jnp.float32)

    # Samples packed per grid step: biggest divisor of N keeping >= 2 grid
    # steps on the "parallel" axis so both of v7x's TensorCores get work.
    if samples_per_step is None:
        samples_per_step = max(1, N // 2)
    Nb = max(1, min(samples_per_step, N))
    while N % Nb:
        Nb -= 1
    assert (Nb * HW) % 128 == 0 or Nb == N, "lane block must be 128-aligned"

    out_lanes = _downskip_pallas(xp_lanes, w1r, b1r, w2r, b2r, Hp, Wp, Nb)
    return (out_lanes.reshape(Cin + Cc, N, HW)
            .transpose(1, 0, 2)
            .reshape(N, Cin + Cc, Hp, Wp))                       # NCHW


# ------------------------------- reference --------------------------------- #
def _ref_downskip(x, w1, b1, w2, b2, bf16_matmul=False):
    xp = lax.reduce_window(x, -jnp.inf, lax.max,
                           (1, 1, 2, 2), (1, 1, 2, 2), "VALID")
    dn = ("NCHW", "HWIO", "NCHW")

    def conv(h, w):
        if bf16_matmul:  # mirror the kernel's bf16 MXU operands / f32 accum
            h, w = h.astype(jnp.bfloat16), w.astype(jnp.bfloat16)
        return lax.conv_general_dilated(
            h, w, (1, 1), "SAME", dimension_numbers=dn,
            preferred_element_type=jnp.float32,
            precision=lax.Precision.HIGHEST)

    h = jnp.maximum(conv(xp, w1) + b1[None, :, None, None], 0.0)
    h = jnp.maximum(conv(h, w2) + b2[None, :, None, None], 0.0)
    return jnp.concatenate([xp, h], axis=1)


# --------------------------------- main ------------------------------------ #
if __name__ == "__main__":
    key = jax.random.PRNGKey(0)
    in_channels, out_channels = 8, 16        # DownSkip(in_channels, out_channels)
    Cc = out_channels // 2                   # DoubleConv(in, out//2), mid = out//2
    N, H, W = 4, 32, 32                      # pooled 16x16 -> HW=256; Nb=2, grid=2

    k1, k2, k3, k4, k5 = jax.random.split(key, 5)
    x = jax.random.normal(k1, (N, in_channels, H, W), jnp.float32)    # NCHW
    params = {
        "w1": jax.random.normal(k2, (3, 3, in_channels, Cc), jnp.float32) * 0.1,
        "b1": jax.random.normal(k3, (Cc,), jnp.float32) * 0.1,
        "w2": jax.random.normal(k4, (3, 3, Cc, Cc), jnp.float32) * 0.1,
        "b2": jax.random.normal(k5, (Cc,), jnp.float32) * 0.1,
    }

    fwd = jax.jit(downskip_forward)
    out = jax.block_until_ready(fwd(x, params))
    assert out.shape == (N, in_channels + Cc, H // 2, W // 2), out.shape

    # (1) Kernel-logic check against a reference using the same bf16 MXU
    #     operand quantization (tight tolerance).
    ref_q = _ref_downskip(x, params["w1"], params["b1"], params["w2"],
                          params["b2"], bf16_matmul=True)
    err_q = float(jnp.max(jnp.abs(out - ref_q)))
    assert jnp.allclose(out, ref_q, atol=2e-3, rtol=2e-3), err_q

    # (2) Fidelity vs the full-f32 module semantics (only bf16 MXU rounding).
    ref = _ref_downskip(x, params["w1"], params["b1"], params["w2"],
                        params["b2"], bf16_matmul=False)
    err = float(jnp.max(jnp.abs(out - ref)))
    assert jnp.allclose(out, ref, atol=3e-2, rtol=3e-2), err

    print("KERNEL_OK")
</pallas_src>

<mosaic_0001>
module attributes {stable_mosaic.version = 11 : i64} {
  func.func @_downskip_kernel(%arg0: i32, %arg1: memref<8x512xf32, #tpu.memory_space<vmem>>, %arg2: memref<8x72xbf16, #tpu.memory_space<vmem>>, %arg3: memref<8x1xf32, #tpu.memory_space<vmem>>, %arg4: memref<8x72xbf16, #tpu.memory_space<vmem>>, %arg5: memref<8x1xf32, #tpu.memory_space<vmem>>, %arg6: memref<16x512xf32, #tpu.memory_space<vmem>>, %arg7: memref<72x512xf32, #tpu.memory_space<vmem>>) attributes {dimension_semantics = [#tpu.dimension_semantics<parallel>], iteration_bounds = array<i64: 2>, scalar_prefetch = 0 : i64, scratch_operands = 1 : i64, tpu.core_type = #tpu.core_type<tc>, window_params = [{transform_indices = @transform_0, window_bounds = array<i64: 8, 512>}, {pipeline_mode = #tpu.pipeline_mode<synchronous>, transform_indices = @transform_1, window_bounds = array<i64: 8, 72>}, {pipeline_mode = #tpu.pipeline_mode<synchronous>, transform_indices = @transform_2, window_bounds = array<i64: 8, 1>}, {pipeline_mode = #tpu.pipeline_mode<synchronous>, transform_indices = @transform_3, window_bounds = array<i64: 8, 72>}, {pipeline_mode = #tpu.pipeline_mode<synchronous>, transform_indices = @transform_4, window_bounds = array<i64: 8, 1>}, {transform_indices = @transform_5, window_bounds = array<i64: 16, 512>}]} {
    %0 = tpu.iota {dimensions = array<i32: 1>} : vector<1x512xi32>
    %c16_i32 = arith.constant 16 : i32
    %c0_i32 = arith.constant 0 : i32
    %1 = arith.cmpi eq, %c16_i32, %c0_i32 : i32
    %c1_i32 = arith.constant 1 : i32
    %2 = arith.select %1, %c1_i32, %c16_i32 : i32
    %3 = vector.broadcast %2 : i32 to vector<1x512xi32>
    %4 = arith.remsi %0, %3 : vector<1x512xi32>
    %c0_i32_0 = arith.constant 0 : i32
    %5 = vector.broadcast %c0_i32_0 : i32 to vector<1x512xi32>
    %6 = arith.cmpi ne, %4, %5 : vector<1x512xi32>
    %c0_i32_1 = arith.constant 0 : i32
    %7 = vector.broadcast %c0_i32_1 : i32 to vector<1x512xi32>
    %8 = arith.cmpi slt, %4, %7 : vector<1x512xi32>
    %c0_i32_2 = arith.constant 0 : i32
    %9 = arith.cmpi slt, %2, %c0_i32_2 : i32
    %10 = vector.broadcast %9 : i1 to vector<1x512xi1>
    %11 = vector.broadcast %10 : vector<1x512xi1> to vector<1x512xi1>
    %12 = arith.xori %8, %11 : vector<1x512xi1>
    %13 = arith.andi %12, %6 : vector<1x512xi1>
    %14 = vector.broadcast %2 : i32 to vector<1x512xi32>
    %15 = arith.addi %4, %14 : vector<1x512xi32>
    %16 = arith.select %13, %15, %4 : vector<1x512xi1>, vector<1x512xi32>
    %c256_i32 = arith.constant 256 : i32
    %c0_i32_3 = arith.constant 0 : i32
    %17 = arith.cmpi eq, %c256_i32, %c0_i32_3 : i32
    %c1_i32_4 = arith.constant 1 : i32
    %18 = arith.select %17, %c1_i32_4, %c256_i32 : i32
    %19 = vector.broadcast %18 : i32 to vector<1x512xi32>
    %20 = arith.remsi %0, %19 : vector<1x512xi32>
    %c0_i32_5 = arith.constant 0 : i32
    %21 = vector.broadcast %c0_i32_5 : i32 to vector<1x512xi32>
    %22 = arith.cmpi ne, %20, %21 : vector<1x512xi32>
    %c0_i32_6 = arith.constant 0 : i32
    %23 = vector.broadcast %c0_i32_6 : i32 to vector<1x512xi32>
    %24 = arith.cmpi slt, %20, %23 : vector<1x512xi32>
    %c0_i32_7 = arith.constant 0 : i32
    %25 = arith.cmpi slt, %18, %c0_i32_7 : i32
    %26 = vector.broadcast %25 : i1 to vector<1x512xi1>
    %27 = vector.broadcast %26 : vector<1x512xi1> to vector<1x512xi1>
    %28 = arith.xori %24, %27 : vector<1x512xi1>
    %29 = arith.andi %28, %22 : vector<1x512xi1>
    %30 = vector.broadcast %18 : i32 to vector<1x512xi32>
    %31 = arith.addi %20, %30 : vector<1x512xi32>
    %32 = arith.select %29, %31, %20 : vector<1x512xi1>, vector<1x512xi32>
    %c1_i32_8 = arith.constant 1 : i32
    %33 = vector.broadcast %c1_i32_8 : i32 to vector<1x512xi32>
    %34 = arith.cmpi sge, %16, %33 : vector<1x512xi32>
    %35 = arith.extui %34 : vector<1x512xi1> to vector<1x512xi32>
    %36 = arith.sitofp %35 : vector<1x512xi32> to vector<1x512xf32>
    %c14_i32 = arith.constant 14 : i32
    %37 = vector.broadcast %c14_i32 : i32 to vector<1x512xi32>
    %38 = arith.cmpi sle, %16, %37 : vector<1x512xi32>
    %39 = arith.extui %38 : vector<1x512xi1> to vector<1x512xi32>
    %40 = arith.sitofp %39 : vector<1x512xi32> to vector<1x512xf32>
    %c16_i32_9 = arith.constant 16 : i32
    %41 = vector.broadcast %c16_i32_9 : i32 to vector<1x512xi32>
    %42 = arith.cmpi sge, %32, %41 : vector<1x512xi32>
    %43 = arith.extui %42 : vector<1x512xi1> to vector<1x512xi32>
    %44 = arith.sitofp %43 : vector<1x512xi32> to vector<1x512xf32>
    %c240_i32 = arith.constant 240 : i32
    %45 = vector.broadcast %c240_i32 : i32 to vector<1x512xi32>
    %46 = arith.cmpi slt, %32, %45 : vector<1x512xi32>
    %47 = arith.extui %46 : vector<1x512xi1> to vector<1x512xi32>
    %48 = arith.sitofp %47 : vector<1x512xi32> to vector<1x512xf32>
    %c0 = arith.constant 0 : index
    %c0_10 = arith.constant 0 : index
    %49 = vector.load %arg1[%c0, %c0_10] : memref<8x512xf32, #tpu.memory_space<vmem>>, vector<8x512xf32>
    %50 = vector.shape_cast %36 : vector<1x512xf32> to vector<1x512xf32>
    %51 = vector.broadcast %50 : vector<1x512xf32> to vector<8x512xf32>
    %52 = vector.shape_cast %40 : vector<1x512xf32> to vector<1x512xf32>
    %53 = vector.broadcast %52 : vector<1x512xf32> to vector<8x512xf32>
    %54 = vector.shape_cast %44 : vector<1x512xf32> to vector<1x512xf32>
    %55 = vector.broadcast %54 : vector<1x512xf32> to vector<8x512xf32>
    %56 = vector.shape_cast %48 : vector<1x512xf32> to vector<1x512xf32>
    %57 = vector.broadcast %56 : vector<1x512xf32> to vector<8x512xf32>
    %c1_i32_11 = arith.constant 1 : i32
    %58 = tpu.dynamic_rotate %49 by %c1_i32_11 dim 1 : vector<8x512xf32>, i32 -> vector<8x512xf32>
    %59 = arith.mulf %58, %51 : vector<8x512xf32>
    %c511_i32 = arith.constant 511 : i32
    %60 = tpu.dynamic_rotate %49 by %c511_i32 dim 1 : vector<8x512xf32>, i32 -> vector<8x512xf32>
    %61 = arith.mulf %60, %53 : vector<8x512xf32>
    %c16_i32_12 = arith.constant 16 : i32
    %62 = tpu.dynamic_rotate %59 by %c16_i32_12 dim 1 : vector<8x512xf32>, i32 -> vector<8x512xf32>
    %63 = arith.mulf %62, %55 : vector<8x512xf32>
    %c0_13 = arith.constant 0 : index
    %c0_14 = arith.constant 0 : index
    %64 = vector.load %arg7[%c0_13, %c0_14] : memref<72x512xf32, #tpu.memory_space<vmem>>, vector<8x512xf32>
    tpu.vector_store %arg7[%c0_13, %c0_14], %63 {strides = array<i32>} : memref<72x512xf32, #tpu.memory_space<vmem>>, vector<8x512xf32>,
    %c24 = arith.constant 24 : index
    %c0_15 = arith.constant 0 : index
    %65 = vector.load %arg7[%c24, %c0_15] : memref<72x512xf32, #tpu.memory_space<vmem>>, vector<8x512xf32>
    tpu.vector_store %arg7[%c24, %c0_15], %59 {strides = array<i32>} : memref<72x512xf32, #tpu.memory_space<vmem>>, vector<8x512xf32>,
    %c496_i32 = arith.constant 496 : i32
    %66 = tpu.dynamic_rotate %59 by %c496_i32 dim 1 : vector<8x512xf32>, i32 -> vector<8x512xf32>
    %67 = arith.mulf %66, %57 : vector<8x512xf32>
    %c48 = arith.constant 48 : index
    %c0_16 = arith.constant 0 : index
    %68 = vector.load %arg7[%c48, %c0_16] : memref<72x512xf32, #tpu.memory_space<vmem>>, vector<8x512xf32>
    tpu.vector_store %arg7[%c48, %c0_16], %67 {strides = array<i32>} : memref<72x512xf32, #tpu.memory_space<vmem>>, vector<8x512xf32>,
    %c16_i32_17 = arith.constant 16 : i32
    %69 = tpu.dynamic_rotate %49 by %c16_i32_17 dim 1 : vector<8x512xf32>, i32 -> vector<8x512xf32>
    %70 = arith.mulf %69, %55 : vector<8x512xf32>
    %c8 = arith.constant 8 : index
    %c0_18 = arith.constant 0 : index
    %71 = vector.load %arg7[%c8, %c0_18] : memref<72x512xf32, #tpu.memory_space<vmem>>, vector<8x512xf32>
    tpu.vector_store %arg7[%c8, %c0_18], %70 {strides = array<i32>} : memref<72x512xf32, #tpu.memory_space<vmem>>, vector<8x512xf32>,
    %c32 = arith.constant 32 : index
    %c0_19 = arith.constant 0 : index
    %72 = vector.load %arg7[%c32, %c0_19] : memref<72x512xf32, #tpu.memory_space<vmem>>, vector<8x512xf32>
    tpu.vector_store %arg7[%c32, %c0_19], %49 {strides = array<i32>} : memref<72x512xf32, #tpu.memory_space<vmem>>, vector<8x512xf32>,
    %c496_i32_20 = arith.constant 496 : i32
    %73 = tpu.dynamic_rotate %49 by %c496_i32_20 dim 1 : vector<8x512xf32>, i32 -> vector<8x512xf32>
    %74 = arith.mulf %73, %57 : vector<8x512xf32>
    %c56 = arith.constant 56 : index
    %c0_21 = arith.constant 0 : index
    %75 = vector.load %arg7[%c56, %c0_21] : memref<72x512xf32, #tpu.memory_space<vmem>>, vector<8x512xf32>
    tpu.vector_store %arg7[%c56, %c0_21], %74 {strides = array<i32>} : memref<72x512xf32, #tpu.memory_space<vmem>>, vector<8x512xf32>,
    %c16_i32_22 = arith.constant 16 : i32
    %76 = tpu.dynamic_rotate %61 by %c16_i32_22 dim 1 : vector<8x512xf32>, i32 -> vector<8x512xf32>
    %77 = arith.mulf %76, %55 : vector<8x512xf32>
    %c16 = arith.constant 16 : index
    %c0_23 = arith.constant 0 : index
    %78 = vector.load %arg7[%c16, %c0_23] : memref<72x512xf32, #tpu.memory_space<vmem>>, vector<8x512xf32>
    tpu.vector_store %arg7[%c16, %c0_23], %77 {strides = array<i32>} : memref<72x512xf32, #tpu.memory_space<vmem>>, vector<8x512xf32>,
    %c40 = arith.constant 40 : index
    %c0_24 = arith.constant 0 : index
    %79 = vector.load %arg7[%c40, %c0_24] : memref<72x512xf32, #tpu.memory_space<vmem>>, vector<8x512xf32>
    tpu.vector_store %arg7[%c40, %c0_24], %61 {strides = array<i32>} : memref<72x512xf32, #tpu.memory_space<vmem>>, vector<8x512xf32>,
    %c496_i32_25 = arith.constant 496 : i32
    %80 = tpu.dynamic_rotate %61 by %c496_i32_25 dim 1 : vector<8x512xf32>, i32 -> vector<8x512xf32>
    %81 = arith.mulf %80, %57 : vector<8x512xf32>
    %c64 = arith.constant 64 : index
    %c0_26 = arith.constant 0 : index
    %82 = vector.load %arg7[%c64, %c0_26] : memref<72x512xf32, #tpu.memory_space<vmem>>, vector<8x512xf32>
    tpu.vector_store %arg7[%c64, %c0_26], %81 {strides = array<i32>} : memref<72x512xf32, #tpu.memory_space<vmem>>, vector<8x512xf32>,
    %c0_27 = arith.constant 0 : index
    %c0_28 = arith.constant 0 : index
    %83 = vector.load %arg7[%c0_27, %c0_28] : memref<72x512xf32, #tpu.memory_space<vmem>>, vector<72x512xf32>
    %84 = arith.truncf %83 : vector<72x512xf32> to vector<72x512xbf16>
    %c0_29 = arith.constant 0 : index
    %c0_30 = arith.constant 0 : index
    %85 = vector.load %arg2[%c0_29, %c0_30] : memref<8x72xbf16, #tpu.memory_space<vmem>>, vector<8x72xbf16>
    %cst = arith.constant dense<0.000000e+00> : vector<8x512xf32>
    %86 = tpu.matmul %85, %84, %cst {dimension_numbers = #tpu.dot_dimension_numbers<[1], [0], [0], [1], [0, 0, 1, 1], [], []>} : vector<8x72xbf16>, vector<72x512xbf16>, vector<8x512xf32> -> vector<8x512xf32>
    %c0_31 = arith.constant 0 : index
    %c0_32 = arith.constant 0 : index
    %87 = vector.load %arg3[%c0_31, %c0_32] : memref<8x1xf32, #tpu.memory_space<vmem>>, vector<8x1xf32>
    %88 = vector.broadcast %87 : vector<8x1xf32> to vector<8x512xf32>
    %89 = arith.addf %86, %88 : vector<8x512xf32>
    %cst_33 = arith.constant 0.000000e+00 : f32
    %90 = vector.broadcast %cst_33 : f32 to vector<8x512xf32>
    %91 = arith.maximumf %89, %90 : vector<8x512xf32>
    %92 = vector.shape_cast %36 : vector<1x512xf32> to vector<1x512xf32>
    %93 = vector.broadcast %92 : vector<1x512xf32> to vector<8x512xf32>
    %94 = vector.shape_cast %40 : vector<1x512xf32> to vector<1x512xf32>
    %95 = vector.broadcast %94 : vector<1x512xf32> to vector<8x512xf32>
    %96 = vector.shape_cast %44 : vector<1x512xf32> to vector<1x512xf32>
    %97 = vector.broadcast %96 : vector<1x512xf32> to vector<8x512xf32>
    %98 = vector.shape_cast %48 : vector<1x512xf32> to vector<1x512xf32>
    %99 = vector.broadcast %98 : vector<1x512xf32> to vector<8x512xf32>
    %c1_i32_34 = arith.constant 1 : i32
    %100 = tpu.dynamic_rotate %91 by %c1_i32_34 dim 1 : vector<8x512xf32>, i32 -> vector<8x512xf32>
    %101 = arith.mulf %100, %93 : vector<8x512xf32>
    %c511_i32_35 = arith.constant 511 : i32
    %102 = tpu.dynamic_rotate %91 by %c511_i32_35 dim 1 : vector<8x512xf32>, i32 -> vector<8x512xf32>
    %103 = arith.mulf %102, %95 : vector<8x512xf32>
    %c16_i32_36 = arith.constant 16 : i32
    %104 = tpu.dynamic_rotate %101 by %c16_i32_36 dim 1 : vector<8x512xf32>, i32 -> vector<8x512xf32>
    %105 = arith.mulf %104, %97 : vector<8x512xf32>
    %c0_37 = arith.constant 0 : index
    %c0_38 = arith.constant 0 : index
    %106 = vector.load %arg7[%c0_37, %c0_38] : memref<72x512xf32, #tpu.memory_space<vmem>>, vector<8x512xf32>
    tpu.vector_store %arg7[%c0_37, %c0_38], %105 {strides = array<i32>} : memref<72x512xf32, #tpu.memory_space<vmem>>, vector<8x512xf32>,
    %c24_39 = arith.constant 24 : index
    %c0_40 = arith.constant 0 : index
    %107 = vector.load %arg7[%c24_39, %c0_40] : memref<72x512xf32, #tpu.memory_space<vmem>>, vector<8x512xf32>
    tpu.vector_store %arg7[%c24_39, %c0_40], %101 {strides = array<i32>} : memref<72x512xf32, #tpu.memory_space<vmem>>, vector<8x512xf32>,
    %c496_i32_41 = arith.constant 496 : i32
    %108 = tpu.dynamic_rotate %101 by %c496_i32_41 dim 1 : vector<8x512xf32>, i32 -> vector<8x512xf32>
    %109 = arith.mulf %108, %99 : vector<8x512xf32>
    %c48_42 = arith.constant 48 : index
    %c0_43 = arith.constant 0 : index
    %110 = vector.load %arg7[%c48_42, %c0_43] : memref<72x512xf32, #tpu.memory_space<vmem>>, vector<8x512xf32>
    tpu.vector_store %arg7[%c48_42, %c0_43], %109 {strides = array<i32>} : memref<72x512xf32, #tpu.memory_space<vmem>>, vector<8x512xf32>,
    %c16_i32_44 = arith.constant 16 : i32
    %111 = tpu.dynamic_rotate %91 by %c16_i32_44 dim 1 : vector<8x512xf32>, i32 -> vector<8x512xf32>
    %112 = arith.mulf %111, %97 : vector<8x512xf32>
    %c8_45 = arith.constant 8 : index
    %c0_46 = arith.constant 0 : index
    %113 = vector.load %arg7[%c8_45, %c0_46] : memref<72x512xf32, #tpu.memory_space<vmem>>, vector<8x512xf32>
    tpu.vector_store %arg7[%c8_45, %c0_46], %112 {strides = array<i32>} : memref<72x512xf32, #tpu.memory_space<vmem>>, vector<8x512xf32>,
    %c32_47 = arith.constant 32 : index
    %c0_48 = arith.constant 0 : index
    %114 = vector.load %arg7[%c32_47, %c0_48] : memref<72x512xf32, #tpu.memory_space<vmem>>, vector<8x512xf32>
    tpu.vector_store %arg7[%c32_47, %c0_48], %91 {strides = array<i32>} : memref<72x512xf32, #tpu.memory_space<vmem>>, vector<8x512xf32>,
    %c496_i32_49 = arith.constant 496 : i32
    %115 = tpu.dynamic_rotate %91 by %c496_i32_49 dim 1 : vector<8x512xf32>, i32 -> vector<8x512xf32>
    %116 = arith.mulf %115, %99 : vector<8x512xf32>
    %c56_50 = arith.constant 56 : index
    %c0_51 = arith.constant 0 : index
    %117 = vector.load %arg7[%c56_50, %c0_51] : memref<72x512xf32, #tpu.memory_space<vmem>>, vector<8x512xf32>
    tpu.vector_store %arg7[%c56_50, %c0_51], %116 {strides = array<i32>} : memref<72x512xf32, #tpu.memory_space<vmem>>, vector<8x512xf32>,
    %c16_i32_52 = arith.constant 16 : i32
    %118 = tpu.dynamic_rotate %103 by %c16_i32_52 dim 1 : vector<8x512xf32>, i32 -> vector<8x512xf32>
    %119 = arith.mulf %118, %97 : vector<8x512xf32>
    %c16_53 = arith.constant 16 : index
    %c0_54 = arith.constant 0 : index
    %120 = vector.load %arg7[%c16_53, %c0_54] : memref<72x512xf32, #tpu.memory_space<vmem>>, vector<8x512xf32>
    tpu.vector_store %arg7[%c16_53, %c0_54], %119 {strides = array<i32>} : memref<72x512xf32, #tpu.memory_space<vmem>>, vector<8x512xf32>,
    %c40_55 = arith.constant 40 : index
    %c0_56 = arith.constant 0 : index
    %121 = vector.load %arg7[%c40_55, %c0_56] : memref<72x512xf32, #tpu.memory_space<vmem>>, vector<8x512xf32>
    tpu.vector_store %arg7[%c40_55, %c0_56], %103 {strides = array<i32>} : memref<72x512xf32, #tpu.memory_space<vmem>>, vector<8x512xf32>,
    %c496_i32_57 = arith.constant 496 : i32
    %122 = tpu.dynamic_rotate %103 by %c496_i32_57 dim 1 : vector<8x512xf32>, i32 -> vector<8x512xf32>
    %123 = arith.mulf %122, %99 : vector<8x512xf32>
    %c64_58 = arith.constant 64 : index
    %c0_59 = arith.constant 0 : index
    %124 = vector.load %arg7[%c64_58, %c0_59] : memref<72x512xf32, #tpu.memory_space<vmem>>, vector<8x512xf32>
    tpu.vector_store %arg7[%c64_58, %c0_59], %123 {strides = array<i32>} : memref<72x512xf32, #tpu.memory_space<vmem>>, vector<8x512xf32>,
    %c0_60 = arith.constant 0 : index
    %c0_61 = arith.constant 0 : index
    %125 = vector.load %arg7[%c0_60, %c0_61] : memref<72x512xf32, #tpu.memory_space<vmem>>, vector<72x512xf32>
    %126 = arith.truncf %125 : vector<72x512xf32> to vector<72x512xbf16>
    %c0_62 = arith.constant 0 : index
    %c0_63 = arith.constant 0 : index
    %127 = vector.load %arg4[%c0_62, %c0_63] : memref<8x72xbf16, #tpu.memory_space<vmem>>, vector<8x72xbf16>
    %cst_64 = arith.constant dense<0.000000e+00> : vector<8x512xf32>
    %128 = tpu.matmul %127, %126, %cst_64 {dimension_numbers = #tpu.dot_dimension_numbers<[1], [0], [0], [1], [0, 0, 1, 1], [], []>} : vector<8x72xbf16>, vector<72x512xbf16>, vector<8x512xf32> -> vector<8x512xf32>
    %c0_65 = arith.constant 0 : index
    %c0_66 = arith.constant 0 : index
    %129 = vector.load %arg5[%c0_65, %c0_66] : memref<8x1xf32, #tpu.memory_space<vmem>>, vector<8x1xf32>
    %130 = vector.broadcast %129 : vector<8x1xf32> to vector<8x512xf32>
    %131 = arith.addf %128, %130 : vector<8x512xf32>
    %cst_67 = arith.constant 0.000000e+00 : f32
    %132 = vector.broadcast %cst_67 : f32 to vector<8x512xf32>
    %133 = arith.maximumf %131, %132 : vector<8x512xf32>
    %c0_68 = arith.constant 0 : index
    %c0_69 = arith.constant 0 : index
    %134 = vector.load %arg6[%c0_68, %c0_69] : memref<16x512xf32, #tpu.memory_space<vmem>>, vector<8x512xf32>
    tpu.vector_store %arg6[%c0_68, %c0_69], %49 {strides = array<i32>} : memref<16x512xf32, #tpu.memory_space<vmem>>, vector<8x512xf32>,
    %c8_70 = arith.constant 8 : index
    %c0_71 = arith.constant 0 : index
    %135 = vector.load %arg6[%c8_70, %c0_71] : memref<16x512xf32, #tpu.memory_space<vmem>>, vector<8x512xf32>
    tpu.vector_store %arg6[%c8_70, %c0_71], %133 {strides = array<i32>} : memref<16x512xf32, #tpu.memory_space<vmem>>, vector<8x512xf32>,
    return
  }
  func.func @transform_0(%arg0: i32) -> (i32, i32) {
    %c0_i32 = arith.constant 0 : i32
    %c0_i32_0 = arith.constant 0 : i32
    return %c0_i32, %arg0 : i32, i32
  }
  func.func @transform_1(%arg0: i32) -> (i32, i32) {
    %c0_i32 = arith.constant 0 : i32
    %c0_i32_0 = arith.constant 0 : i32
    %c0_i32_1 = arith.constant 0 : i32
    return %c0_i32, %c0_i32_0 : i32, i32
  }
  func.func @transform_2(%arg0: i32) -> (i32, i32) {
    %c0_i32 = arith.constant 0 : i32
    %c0_i32_0 = arith.constant 0 : i32
    %c0_i32_1 = arith.constant 0 : i32
    return %c0_i32, %c0_i32_0 : i32, i32
  }
  func.func @transform_3(%arg0: i32) -> (i32, i32) {
    %c0_i32 = arith.constant 0 : i32
    %c0_i32_0 = arith.constant 0 : i32
    %c0_i32_1 = arith.constant 0 : i32
    return %c0_i32, %c0_i32_0 : i32, i32
  }
  func.func @transform_4(%arg0: i32) -> (i32, i32) {
    %c0_i32 = arith.constant 0 : i32
    %c0_i32_0 = arith.constant 0 : i32
    %c0_i32_1 = arith.constant 0 : i32
    return %c0_i32, %c0_i32_0 : i32, i32
  }
  func.func @transform_5(%arg0: i32) -> (i32, i32) {
    %c0_i32 = arith.constant 0 : i32
    %c0_i32_0 = arith.constant 0 : i32
    return %c0_i32, %arg0 : i32, i32
  }
}

</mosaic_0001>

<bundles_post_ra>
// kernel: downskip_forward.1
= control target key start
LH: loop header
LB: loop body
LE: loop exit
PB: predicated region body
PF: predicated region fallthrough
CT: control target
= control target key end

     0   :  { %s1262_s18 = smov 0   ;;  %s1264_s19 = smov 0   ;;  %s1798_s0 = inlined_call_operand.vmem [shape: f32[8,1024], index: 0, kind: input, shape index: {}]   ;;  %s1799_s1 = inlined_call_operand.vmem [shape: bf16[8,72], index: 1, kind: input, shape index: {}]   ;;  %s1800_s2 = inlined_call_operand.vmem [shape: f32[8,1], index: 2, kind: input, shape index: {}]   ;;  %s1801_s3 = inlined_call_operand.vmem [shape: bf16[8,72], index: 3, kind: input, shape index: {}]   ;;  %s1802_s4 = inlined_call_operand.vmem [shape: f32[8,1], index: 4, kind: input, shape index: {}]   ;;  %s1803_s5 = inlined_call_operand.vmem [shape: f32[16,1024], index: 5, kind: output, shape index: {}]  }
   0x1   :  { %s1266_s20 = smov 0  }
   0x2 LB: > { %s1273_s21 = sadd.s32 4294967295, %s1224_s20   ;;  %s1275_s22 = sadd.s32 1, %s1224_s20   ;;  %s1224_s20 = sphi %s1266_s20, %s1807_s20   ;;  %s1220_s19 = sphi %s1264_s19, %s1806_s19   ;;  %s1216_s18 = sphi %s1262_s18, %s1805_s18  }
   0x3   : > { %s129_s23 = ssub.s32 %s1224_s20, %s1275_s22  ;;  %s132_s24 = sadd.s32 1, %s1220_s19 }
   0x4   : > { %p130_p0 = scmp.eq.s32.totalorder %s129_s23, 0  ;;  %p142_p1 = scmp.ne.s32.totalorder %s1220_s19, %s1216_s18 }
   0x5   : > { %p143_p2 = scmp.eq.s32.totalorder %s1273_s21, 1  ;;  %p1141_p3 = scmp.ge.s32.totalorder %s1224_s20, 1 }
   0x6   : > { %s1282_s25 = scalar_select %p130_p0, %s1220_s19, %s132_s24  }
   0x7   : > { %p1284_p4 = por %p143_p2, %p142_p1  ;;  %p188_p5 = scmp.lt.s32.totalorder %s1224_s20, 3 }
   0x9   : > { %p189_p6 = pnand %p1141_p3, %p188_p5 }
   0xa   : > { %s1143_s27 = sshll.u32 (!%p189_p6), %s1273_s21, 2  ;;  %s212_s28 = sand.u32 (!%p189_p6), 1, %s1216_s18   ;;  %v223_v4 = vlaneseq (!%p189_p6)  ;;  %v1229_v13 = vmov (!%p189_p6), 0.0   ;;  %v1231_v54 = vmov (!%p189_p6), 0   ;;  %v601_v55 = vld [vmem:[%s1800_s2] sm:$0xff] (!%p189_p6) }
   0xb   : > { %192 = sbr.rel (%p189_p6) target bundleno = 1016 (0x3f8), region = 40  ;;  %p216_p7 = scmp.lt.s32.totalorder (!%p189_p6), %s1143_s27, 7  ;;  %656 = vmatprep.mubr.bf16.mxu0 (!%p189_p6), %v1231_v54  ;;  %697 = vmatprep.mubr.bf16.mxu1 (!%p189_p6), %v1231_v54 }
   0xc   : > { %s1142_s29 = sshll.u32 (!%p189_p6), %s212_s28, 6  ;;  %s1226_s9 = smov (!%p189_p6), 1   ;;  %v1322_v5 = vand.u32 (!%p189_p6), 127, %v223_v4  ;;  %1201 = vset.pattern.permute.xlu0 (!%p189_p6), %v1231_v54 }
   0xd   : > { %s1300_s10 = scalar_lea.vmem (!%p189_p6), [#allocation3], %s1142_s29  ;;  %s1227_s11 = smov (!%p189_p6), 127  }
   0xe   : > { %v1329_v6 = vadd.s32 (!%p189_p6), 384, %v1322_v5  ;;  %v225_v7 = vadd.s32 (!%p189_p6), 128, %v1322_v5  ;;  %v226_v8 = vadd.s32 (!%p189_p6), 256, %v1322_v5  ;;  %s1228_s12 = smov (!%p189_p6), 16   ;;  %v280_v12 = vand.u32 (!%p189_p6), 255, %v1322_v5  ;;  %s1230_s13 = smov (!%p189_p6), 112  }
   0xf   : > { %v232_v18 = vand.u32 (!%p189_p6), 15, %v1322_v5  ;;  %vm384_vm6 = vcmp.lt.s32.totalorder (!%p189_p6), %v1322_v5, 1  ;;  %vm401_vm10 = vcmp.lt.s32.totalorder (!%p189_p6), %v1322_v5, 127  ;;  %vm418_vm14 = vcmp.lt.s32.totalorder (!%p189_p6), %v1322_v5, 16 }
  0x10   : > { %v301_v9 = vand.u32 (!%p189_p6), 255, %v1329_v6  ;;  %v287_v10 = vand.u32 (!%p189_p6), 255, %v225_v7  ;;  %v294_v11 = vand.u32 (!%p189_p6), 255, %v226_v8  ;;  %vm348_vm3 = vcmp.ge.s32.totalorder (!%p189_p6), %v280_v12, 16 }
  0x11   : > { %v1353_v17 = vsel (!%p189_p6), %vm348_vm3, 1.0, %v1229_v13  ;;  %v239_v19 = vand.u32 (!%p189_p6), 15, %v225_v7  ;;  %v253_v22 = vand.u32 (!%p189_p6), 15, %v1329_v6  ;;  %vm324_vm4 = vcmp.ge.s32.totalorder (!%p189_p6), %v232_v18, 1 }
  0x12   : > { %s1809_s27 = smov (!%p216_p7, %s1143_s27), 7  ;;  %vm363_vm0 = vcmp.lt.s32.totalorder %v301_v9, 240  ;;  %vm350_vm1 = vcmp.ge.s32.totalorder %v294_v11, 16  ;;  %vm361_vm2 = vcmp.lt.s32.totalorder %v287_v10, 240  ;;  %v246_v23 = vand.u32 15, %v226_v8 }
  0x13   : > { %s1144_s30 = sshll.u32 %s1809_s27, 3  ;;  %v1343_v14 = vsel %vm350_vm1, 1.0, %v1229_v13  ;;  %v1345_v15 = vsel %vm363_vm0, 1.0, %v1229_v13  ;;  %v1347_v16 = vsel %vm361_vm2, 1.0, %v1229_v13  ;;  %vm325_vm5 = vcmp.ge.s32.totalorder %v239_v19, 1  ;;  %s1170_s27 = sshll.u32 (%p1284_p4), %s1273_s21, 5 }
  0x14   : > { %s219_s8 = scalar_lea.vmem %s1798_s0, %s1144_s30  ;;  %v1362_v24 = vsel %vm324_vm4, 1.0, %v1229_v13  ;;  %v1364_v25 = vsel %vm325_vm5, 1.0, %v1229_v13  ;;  %vm327_vm7 = vcmp.ge.s32.totalorder %v253_v22, 1  ;;  %vm326_vm8 = vcmp.ge.s32.totalorder %v246_v23, 1  ;;  %s1055_s30 = scalar_lea.vmem (%p1284_p4), %s1803_s5, %s1170_s27 }
  0x15   : > { %v1292_v0 = vld [vmem:[%s219_s8 + $0x10] sm:$0xff]  ;;  %v1294_v1 = vld [vmem:[%s219_s8] sm:$0xff]  ;;  %v1296_v2 = vld [vmem:[%s219_s8 + $0x18] sm:$0xff]  ;;  %vm336_vm9 = vcmp.le.s32.totalorder %v232_v18, 14  ;;  %v1377_v32 = vsel %vm327_vm7, 1.0, %v1229_v13  ;;  %v1381_v34 = vsel %vm326_vm8, 1.0, %v1229_v13 }
  0x16   : > { %380 = vrot.lane.b32.xlu1 %v1292_v0, %s1226_s9  ;;  %1040 = vst [vmem:[%s1300_s10 + $0x10] sm:$0xff] %v1292_v0  ;;  %376 = vrot.lane.b32.xlu0 %v1294_v1, %s1226_s9  ;;  %1038 = vst [vmem:[%s1300_s10] sm:$0xff] %v1294_v1  ;;  %vm337_vm11 = vcmp.le.s32.totalorder %v239_v19, 14  ;;  %v1389_v38 = vsel %vm336_vm9, 1.0, %v1229_v13  ;;  %vm338_vm12 = vcmp.le.s32.totalorder %v246_v23, 14  ;;  %vm339_vm13 = vcmp.le.s32.totalorder %v253_v22, 14 }
  0x17   : > { %1041 = vst [vmem:[%s1300_s10 + $0x18] sm:$0xff] %v1296_v2  ;;  %v1310_v3 = vld [vmem:[%s219_s8 + $0x8] sm:$0xff]  ;;  %v1399_v42 = vsel %vm337_vm11, 1.0, %v1229_v13  ;;  %v1408_v46 = vsel %vm338_vm12, 1.0, %v1229_v13  ;;  %v1417_v50 = vsel %vm339_vm13, 1.0, %v1229_v13  ;;  %vm443_vm15 = vcmp.lt.s32.totalorder %v1322_v5, 112 }
  0x18   : > { %1039 = vst [vmem:[%s1300_s10 + $0x8] sm:$0xff] %v1310_v3  ;;  %vm611_vm0 = vcmask 1043456   ;;  %vm607_vm1 = vcmask 588800  }
  0x1a   : > { %382 = vrot.lane.b32.xlu1 %v1296_v2, %s1226_s9  ;;  %378 = vrot.lane.b32.xlu0 %v1310_v3, %s1226_s9 }
  0x1e   : > { %395 = vrot.lane.b32.xlu1 %v1310_v3, %s1227_s11  ;;  %393 = vrot.lane.b32.xlu0 %v1294_v1, %s1227_s11 }
  0x22   : > { %399 = vrot.lane.b32.xlu1 %v1296_v2, %s1227_s11  ;;  %397 = vrot.lane.b32.xlu0 %v1292_v0, %s1227_s11 }
  0x26   : > { %458 = vrot.lane.b32.xlu1 %v1310_v3, %s1228_s12  ;;  %456 = vrot.lane.b32.xlu0 %v1294_v1, %s1228_s12 }
  0x2a   : > { %462 = vrot.lane.b32.xlu1 %v1296_v2, %s1228_s12  ;;  %460 = vrot.lane.b32.xlu0 %v1292_v0, %s1228_s12 }
  0x2e   : > { %482 = vrot.lane.b32.xlu1 %v1310_v3, %s1230_s13  ;;  %480 = vrot.lane.b32.xlu0 %v1294_v1, %s1230_s13 }
  0x32   : > { %486 = vrot.lane.b32.xlu1 %v1296_v2, %s1230_s13  ;;  %484 = vrot.lane.b32.xlu0 %v1292_v0, %s1230_s13 }
  0x88   : > { %v381_v20 = vpop.permute.xlu1 %380  ;;  %v377_v21 = vpop.permute.xlu0 %376 }
  0x8c   : > { %v383_v26 = vpop.permute.xlu1 %382  ;;  %v379_v27 = vpop.permute.xlu0 %378 }
  0x8d   : > { %v388_v28 = vsel %vm384_vm6, %v383_v26, %v377_v21  ;;  %v387_v29 = vsel %vm384_vm6, %v377_v21, %v379_v27  ;;  %v385_v33 = vsel %vm384_vm6, %v381_v20, %v383_v26  ;;  %v386_v35 = vsel %vm384_vm6, %v379_v27, %v381_v20 }
  0x8e   : > { %v1371_v30 = vmul.f32 %v1362_v24, %v388_v28  ;;  %v1374_v31 = vmul.f32 %v1364_v25, %v387_v29  ;;  %v1394_v40 = vmul.f32 %v1377_v32, %v385_v33  ;;  %v1397_v41 = vmul.f32 %v1381_v34, %v386_v35 }
  0x90   : > { %v396_v36 = vpop.permute.xlu1 %395  ;;  %410 = vrot.lane.b32.xlu0 %v1371_v30, %s1228_s12  ;;  %412 = vrot.lane.b32.xlu1 %v1374_v31, %s1228_s12  ;;  %v394_v37 = vpop.permute.xlu0 %393 }
  0x91   : > { %v404_v39 = vsel %vm401_vm10, %v394_v37, %v396_v36 }
  0x92   : > { %v1402_v43 = vmul.f32 %v1389_v38, %v404_v39 }
  0x94   : > { %v400_v44 = vpop.permute.xlu1 %399  ;;  %416 = vrot.lane.b32.xlu1 %v1394_v40, %s1228_s12  ;;  %414 = vrot.lane.b32.xlu0 %v1397_v41, %s1228_s12  ;;  %v398_v45 = vpop.permute.xlu0 %397 }
  0x95   : > { %v402_v47 = vsel %vm401_vm10, %v398_v45, %v400_v44  ;;  %v403_v48 = vsel %vm401_vm10, %v396_v36, %v398_v45  ;;  %v405_v51 = vsel %vm401_vm10, %v400_v44, %v394_v37 }
  0x96   : > { %v1415_v49 = vmul.f32 %v1399_v42, %v403_v48  ;;  %v1422_v52 = vmul.f32 %v1408_v46, %v402_v47  ;;  %v1429_v53 = vmul.f32 %v1417_v50, %v405_v51 }
  0x98   : > { %500 = vrot.lane.b32.xlu0 %v1402_v43, %s1228_s12  ;;  %502 = vrot.lane.b32.xlu1 %v1415_v49, %s1228_s12  ;;  %v457_v56 = vpop.permute.xlu0 %456  ;;  %v459_v57 = vpop.permute.xlu1 %458 }
  0x99   : > { %v466_v8 = vsel %vm418_vm14, %v457_v56, %v459_v57 }
  0x9c   : > { %506 = vrot.lane.b32.xlu1 %v1429_v53, %s1228_s12  ;;  %504 = vrot.lane.b32.xlu0 %v1422_v52, %s1228_s12  ;;  %v461_v58 = vpop.permute.xlu0 %460  ;;  %v463_v59 = vpop.permute.xlu1 %462 }
  0x9d   : > { %v467_v9 = vsel %vm418_vm14, %v463_v59, %v457_v56  ;;  %v465_v11 = vsel %vm418_vm14, %v459_v57, %v461_v58  ;;  %v464_v18 = vsel %vm418_vm14, %v461_v58, %v463_v59 }
  0x9e   : > { %v468_v19 = vmul.f32 %v1353_v17, %v467_v9  ;;  %v470_v23 = vmul.f32 %v1343_v14, %v465_v11 }
  0xa0   : > { %437 = vrot.lane.b32.xlu1 %v1374_v31, %s1230_s13  ;;  %435 = vrot.lane.b32.xlu0 %v1371_v30, %s1230_s13  ;;  %v1457_v60 = vpop.permute.xlu0 %480  ;;  %v1459_v61 = vpop.permute.xlu1 %482 }
  0xa4   : > { %441 = vrot.lane.b32.xlu1 %v1394_v40, %s1230_s13  ;;  %439 = vrot.lane.b32.xlu0 %v1397_v41, %s1230_s13  ;;  %v1461_v62 = vpop.permute.xlu0 %484  ;;  %v1463_v63 = vpop.permute.xlu1 %486 }
  0xa8   : > { %526 = vrot.lane.b32.xlu1 %v1415_v49, %s1230_s13  ;;  %524 = vrot.lane.b32.xlu0 %v1402_v43, %s1230_s13 }
  0xac   : > { %530 = vrot.lane.b32.xlu1 %v1429_v53, %s1230_s13  ;;  %528 = vrot.lane.b32.xlu0 %v1422_v52, %s1230_s13 }
  0xb0   : > { %604 = vperm.xlu0 %1201, %v601_v55  }
 0x102   : > { %v413_v4 = vpop.permute.xlu1 %412  ;;  %v411_v6 = vpop.permute.xlu0 %410 }
 0x103   : > { %v421_v7 = vsel %vm418_vm14, %v411_v6, %v413_v4 }
 0x104   : > { %v581_v10 = vpack.c.bf16 %v466_v8, %v421_v7  ;;  %v589_v7 = vpack.c.bf16 %v1415_v49, %v1310_v3  ;;  %v591_v8 = vpack.c.bf16 %v1429_v53, %v1296_v2  ;;  %v590_v3 = vpack.c.bf16 %v1422_v52, %v1292_v0 }
 0x105   : > { %v490_v0 = vsel %vm443_vm15, %v1457_v60, %v1459_v61 }
 0x106   : > { %v417_v12 = vpop.permute.xlu1 %416  ;;  %624 = vmatprep.subr.bf16.mxu0 %v581_v10  ;;  %v415_v13 = vpop.permute.xlu0 %414  ;;  %v588_v10 = vpack.c.bf16 %v1402_v43, %v1294_v1  ;;  %v488_v43 = vsel %vm443_vm15, %v1461_v62, %v1463_v63 }
 0x107   : > { %v422_v20 = vsel %vm418_vm14, %v417_v12, %v411_v6  ;;  %v420_v21 = vsel %vm418_vm14, %v413_v4, %v415_v13  ;;  %v419_v22 = vsel %vm418_vm14, %v415_v13, %v417_v12  ;;  %v491_v6 = vsel %vm443_vm15, %v1463_v63, %v1457_v60 }
 0x108   : > { %v423_v26 = vmul.f32 %v1353_v17, %v422_v20  ;;  %v425_v27 = vmul.f32 %v1343_v14, %v420_v21  ;;  %v583_v28 = vpack.c.bf16 %v464_v18, %v419_v22 }
 0x10a   : > { %v503_v29 = vpop.permute.xlu1 %502  ;;  %665 = vmatprep.subr.bf16.mxu1 %v583_v28  ;;  %v501_v33 = vpop.permute.xlu0 %500  ;;  %v580_v35 = vpack.c.bf16 %v468_v19, %v423_v26  ;;  %v582_v36 = vpack.c.bf16 %v470_v23, %v425_v27 }
 0x10b   : > { %v510_v37 = vsel %vm418_vm14, %v501_v33, %v503_v29 }
 0x10c   : > { %v585_v39 = vpack.c.bf16 %v1374_v31, %v510_v37  ;;  %625 = vmatpush1.bf16.msra.mxu0 %v580_v35  ;;  %666 = vmatpush1.bf16.msra.mxu1 %v582_v36 }
 0x10e   : > { %v507_v44 = vpop.permute.xlu1 %506  ;;  %626 = vmatprep.subr.bf16.mxu0 %v585_v39  ;;  %v505_v45 = vpop.permute.xlu0 %504 }
 0x10f   : > { %v511_v47 = vsel %vm418_vm14, %v507_v44, %v501_v33  ;;  %v508_v48 = vsel %vm418_vm14, %v505_v45, %v507_v44  ;;  %v509_v51 = vsel %vm418_vm14, %v503_v29, %v505_v45  ;;  %v600_v44 = vld [vmem:[%s1799_s1] sm:$0xf] }
 0x110   : > { %v512_v55 = vmul.f32 %v1353_v17, %v511_v47  ;;  %v514_v31 = vmul.f32 %v1343_v14, %v509_v51  ;;  %v587_v56 = vpack.c.bf16 %v1394_v40, %v508_v48  ;;  %v489_v40 = vsel %vm443_vm15, %v1459_v61, %v1461_v62 }
 0x111   : > { %v493_v2 = vmul.f32 %v1347_v16, %v489_v40 }
 0x112   : > { %v438_v57 = vpop.permute.xlu1 %437  ;;  %667 = vmatprep.subr.bf16.mxu1 %v587_v56  ;;  %v436_v58 = vpop.permute.xlu0 %435  ;;  %v584_v59 = vpack.c.bf16 %v1371_v30, %v512_v55  ;;  %v586_v4 = vpack.c.bf16 %v1397_v41, %v514_v31  ;;  %v495_v30 = vmul.f32 %v1345_v15, %v491_v6 }
 0x113   : > { %v446_v49 = vsel %vm443_vm15, %v436_v58, %v438_v57 }
 0x114   : > { %627 = vmatpush1.bf16.msra.mxu0 %v584_v59  ;;  %668 = vmatpush1.bf16.msra.mxu1 %v586_v4  ;;  %v592_v21 = vpack.c.bf16 %v490_v0, %v446_v49 }
 0x115   : > { %628 = vmatprep.subr.bf16.mxu0 %v589_v7  ;;  %669 = vmatprep.subr.bf16.mxu1 %v591_v8 }
 0x116   : > { %v442_v41 = vpop.permute.xlu1 %441  ;;  %v440_v9 = vpop.permute.xlu0 %439 }
 0x117   : > { %v447_v53 = vsel %vm443_vm15, %v442_v41, %v436_v58  ;;  %v445_v11 = vsel %vm443_vm15, %v438_v57, %v440_v9  ;;  %v444_v13 = vsel %vm443_vm15, %v440_v9, %v442_v41 }
 0x118   : > { %v451_v12 = vmul.f32 %v1345_v15, %v447_v53  ;;  %v449_v1 = vmul.f32 %v1347_v16, %v445_v11  ;;  %629 = vmatpush1.bf16.msra.mxu0 %v588_v10  ;;  %670 = vmatpush1.bf16.msra.mxu1 %v590_v3  ;;  %v594_v22 = vpack.c.bf16 %v488_v43, %v444_v13 }
 0x11a   : > { %v527_v52 = vpop.permute.xlu1 %526  ;;  %v525_v18 = vpop.permute.xlu0 %524  ;;  %v593_v19 = vpack.c.bf16 %v493_v2, %v449_v1  ;;  %v595_v20 = vpack.c.bf16 %v495_v30, %v451_v12 }
 0x11b   : > { %v534_v23 = vsel %vm443_vm15, %v525_v18, %v527_v52 }
 0x11c   : > { %630 = vmatprep.subr.bf16.mxu0 %v593_v19  ;;  %671 = vmatprep.subr.bf16.mxu1 %v595_v20  ;;  %v596_v27 = vpack.c.bf16 %v534_v23, %v534_v23 }
 0x11d   : > { %631 = vmatpush1.bf16.msra.mxu0 %v592_v21  ;;  %672 = vmatpush1.bf16.msra.mxu1 %v594_v22 }
 0x11e   : > { %v531_v26 = vpop.permute.xlu1 %530  ;;  %v529_v60 = vpop.permute.xlu0 %528  ;;  %v613_v37 = vsel %vm611_vm0, %v596_v27, 0 }
 0x11f   : > { %v535_v61 = vsel %vm443_vm15, %v531_v26, %v525_v18  ;;  %v532_v62 = vsel %vm443_vm15, %v529_v60, %v531_v26  ;;  %v533_v63 = vsel %vm443_vm15, %v527_v52, %v529_v60 }
 0x120   : > { %v539_v28 = vmul.f32 %v1345_v15, %v535_v61  ;;  %v537_v29 = vmul.f32 %v1347_v16, %v533_v63  ;;  %v598_v33 = vpack.c.bf16 %v532_v62, %v532_v62 }
 0x122   : > { %v599_v35 = vpack.c.bf16 %v539_v28, %v539_v28  ;;  %v597_v36 = vpack.c.bf16 %v537_v29, %v537_v29  ;;  %v619_v39 = vsel %vm611_vm0, %v598_v33, 0 }
 0x124   : > { %1157 = vmatprep.subr.msk.bf16.mxu0 %vm611_vm0, %v597_v36  ;;  %1159 = vmatprep.subr.msk.bf16.mxu1 %vm611_vm0, %v599_v35 }
 0x125   : > { %633 = vmatpush1.bf16.msra.mxu0 %v613_v37  ;;  %674 = vmatpush1.bf16.msra.mxu1 %v619_v39 }
 0x128   : > { %1158 = vmatmul.mubr.msk.bf16.vlgmr.msra.gmra.mrb[0].mxu0 %vm607_vm1, %v600_v44  ;;  %1160 = vmatmul.mubr.msk.bf16.vlgmr.msra.gmra.mrb[0].mxu1 %vm607_vm1, %v600_v44 }
 0x129   : > { %1025 = vmatprep.mubr.bf16.mxu1 %v1231_v54  ;;  %984 = vmatprep.mubr.bf16.mxu0 %v1231_v54 }
 0x12f   : > { %v605_v45 = vpop.permute.xlu0 %604 }
 0x1fb   : > { %v658_v47 = vpop.f32.mrb[0].mxu0  ;;  %v699_v48 = vpop.f32.mrb[0].mxu1 }
 0x1fc   : > { %v659_v51 = vadd.f32 %v658_v47, %v605_v45  ;;  %v700_v55 = vadd.f32 %v699_v48, %v605_v45  ;;  %v660_v31 = vpop.f32.mrb[1].mxu0  ;;  %v701_v56 = vpop.f32.mrb[1].mxu1 }
 0x1fd   : > { %v662_v57 = vpop.f32.mrb[2].mxu0  ;;  %v703_v58 = vpop.f32.mrb[2].mxu1  ;;  %v661_v6 = vadd.f32 %v660_v31, %v605_v45  ;;  %v702_v40 = vadd.f32 %v701_v56, %v605_v45 }
 0x1fe   : > { %v1558_v59 = vmax.f32 %v659_v51, 0.0  ;;  %v1560_v4 = vmax.f32 %v700_v55, 0.0  ;;  %v663_v7 = vpop.f32.mrb[3].mxu0  ;;  %v704_v8 = vpop.f32.mrb[3].mxu1 }
 0x1ff   : > { %v1566_v54 = vmax.f32 %v661_v6, 0.0  ;;  %v1572_v30 = vmax.f32 %v702_v40, 0.0 }
 0x200   : > { %714 = vrot.lane.b32.xlu0 %v1560_v4, %s1226_s9  ;;  %710 = vrot.lane.b32.xlu1 %v1558_v59, %s1226_s9 }
 0x204   : > { %726 = vrot.lane.b32.xlu0 %v1558_v59, %s1227_s11  ;;  %712 = vrot.lane.b32.xlu1 %v1566_v54, %s1226_s9 }
 0x208   : > { %730 = vrot.lane.b32.xlu0 %v1560_v4, %s1227_s11  ;;  %716 = vrot.lane.b32.xlu1 %v1572_v30, %s1226_s9 }
 0x20c   : > { %786 = vrot.lane.b32.xlu0 %v1558_v59, %s1228_s12  ;;  %728 = vrot.lane.b32.xlu1 %v1566_v54, %s1227_s11 }
 0x210   : > { %790 = vrot.lane.b32.xlu0 %v1560_v4, %s1228_s12  ;;  %732 = vrot.lane.b32.xlu1 %v1572_v30, %s1227_s11 }
 0x214   : > { %810 = vrot.lane.b32.xlu0 %v1558_v59, %s1230_s13  ;;  %788 = vrot.lane.b32.xlu1 %v1566_v54, %s1228_s12 }
 0x218   : > { %814 = vrot.lane.b32.xlu0 %v1560_v4, %s1230_s13  ;;  %792 = vrot.lane.b32.xlu1 %v1572_v30, %s1228_s12 }
 0x21c   : > { %812 = vrot.lane.b32.xlu1 %v1566_v54, %s1230_s13 }
 0x220   : > { %816 = vrot.lane.b32.xlu1 %v1572_v30, %s1230_s13 }
 0x272   : > { %v715_v41 = vpop.permute.xlu0 %714  ;;  %v711_v9 = vpop.permute.xlu1 %710 }
 0x276   : > { %v713_v10 = vpop.permute.xlu1 %712  ;;  %v727_v2 = vpop.permute.xlu0 %726 }
 0x277   : > { %v720_v3 = vsel %vm384_vm6, %v711_v9, %v713_v10 }
 0x278   : > { %v1601_v49 = vmul.f32 %v1364_v25, %v720_v3  ;;  %v719_v25 = vsel %vm384_vm6, %v713_v10, %v715_v41 }
 0x27a   : > { %744 = vrot.lane.b32.xlu1 %v1601_v49, %s1228_s12  ;;  %v717_v53 = vpop.permute.xlu1 %716  ;;  %v731_v0 = vpop.permute.xlu0 %730 }
 0x27b   : > { %v718_v11 = vsel %vm384_vm6, %v715_v41, %v717_v53  ;;  %v721_v12 = vsel %vm384_vm6, %v717_v53, %v711_v9 }
 0x27c   : > { %v1610_v13 = vmul.f32 %v1362_v24, %v721_v12  ;;  %v1613_v1 = vmul.f32 %v1377_v32, %v718_v11  ;;  %v1624_v24 = vmul.f32 %v1381_v34, %v719_v25 }
 0x27e   : > { %742 = vrot.lane.b32.xlu0 %v1610_v13, %s1228_s12  ;;  %748 = vrot.lane.b32.xlu1 %v1613_v1, %s1228_s12  ;;  %v729_v43 = vpop.permute.xlu1 %728 }
 0x27f   : > { %v735_v52 = vsel %vm401_vm10, %v729_v43, %v731_v0  ;;  %v736_v18 = vsel %vm401_vm10, %v727_v2, %v729_v43 }
 0x280   : > { %v1627_v32 = vmul.f32 %v1399_v42, %v735_v52  ;;  %v1638_v21 = vmul.f32 %v1389_v38, %v736_v18  ;;  %v931_v38 = vld [vmem:[%s1802_s4] sm:$0xff] }
 0x282   : > { %746 = vrot.lane.b32.xlu0 %v1624_v24, %s1228_s12  ;;  %832 = vrot.lane.b32.xlu1 %v1627_v32, %s1228_s12  ;;  %v733_v19 = vpop.permute.xlu1 %732  ;;  %v919_v43 = vpack.c.bf16 %v1627_v32, %v1566_v54 }
 0x283   : > { %v737_v20 = vsel %vm401_vm10, %v733_v19, %v727_v2  ;;  %v734_v42 = vsel %vm401_vm10, %v731_v0, %v733_v19 }
 0x284   : > { %v1641_v34 = vmul.f32 %v1417_v50, %v737_v20  ;;  %v1650_v22 = vmul.f32 %v1408_v46, %v734_v42  ;;  %v787_v50 = vpop.permute.xlu0 %786 }
 0x286   : > { %830 = vrot.lane.b32.xlu0 %v1638_v21, %s1228_s12  ;;  %836 = vrot.lane.b32.xlu1 %v1641_v34, %s1228_s12  ;;  %v789_v46 = vpop.permute.xlu1 %788  ;;  %v921_v54 = vpack.c.bf16 %v1641_v34, %v1572_v30 }
 0x287   : > { %v796_v35 = vsel %vm418_vm14, %v787_v50, %v789_v46 }
 0x288   : > { %v791_v26 = vpop.permute.xlu0 %790 }
 0x289   : > { %v795_v47 = vsel %vm418_vm14, %v789_v46, %v791_v26 }
 0x28a   : > { %768 = vrot.lane.b32.xlu1 %v1601_v49, %s1230_s13  ;;  %834 = vrot.lane.b32.xlu0 %v1650_v22, %s1228_s12  ;;  %v793_v23 = vpop.permute.xlu1 %792  ;;  %v800_v58 = vmul.f32 %v1343_v14, %v795_v47 }
 0x28b   : > { %v797_v28 = vsel %vm418_vm14, %v793_v23, %v787_v50  ;;  %v794_v31 = vsel %vm418_vm14, %v791_v26, %v793_v23 }
 0x28c   : > { %v1675_v61 = vpop.permute.xlu0 %810  ;;  %v798_v39 = vmul.f32 %v1353_v17, %v797_v28 }
 0x28e   : > { %772 = vrot.lane.b32.xlu1 %v1613_v1, %s1230_s13  ;;  %766 = vrot.lane.b32.xlu0 %v1610_v13, %s1230_s13  ;;  %v1673_v60 = vpop.permute.xlu1 %812 }
 0x290   : > { %v1679_v63 = vpop.permute.xlu0 %814 }
 0x292   : > { %856 = vrot.lane.b32.xlu1 %v1627_v32, %s1230_s13  ;;  %770 = vrot.lane.b32.xlu0 %v1624_v24, %s1230_s13  ;;  %v1677_v62 = vpop.permute.xlu1 %816 }
 0x296   : > { %860 = vrot.lane.b32.xlu1 %v1641_v34, %s1230_s13  ;;  %854 = vrot.lane.b32.xlu0 %v1638_v21, %s1230_s13 }
 0x29a   : > { %858 = vrot.lane.b32.xlu0 %v1650_v22, %s1230_s13 }
 0x29e   : > { %934 = vperm.xlu0 %1201, %v931_v38  }
 0x2ec   : > { %v745_v27 = vpop.permute.xlu1 %744 }
 0x2f0   : > { %v743_v29 = vpop.permute.xlu0 %742  ;;  %v749_v33 = vpop.permute.xlu1 %748 }
 0x2f1   : > { %v752_v36 = vsel %vm418_vm14, %v743_v29, %v745_v27  ;;  %v753_v37 = vsel %vm418_vm14, %v749_v33, %v743_v29 }
 0x2f2   : > { %v911_v44 = vpack.c.bf16 %v796_v35, %v752_v36  ;;  %v754_v45 = vmul.f32 %v1353_v17, %v753_v37 }
 0x2f4   : > { %v910_v48 = vpack.c.bf16 %v798_v39, %v754_v45  ;;  %v747_v51 = vpop.permute.xlu0 %746  ;;  %952 = vmatprep.subr.bf16.mxu0 %v911_v44  ;;  %v833_v55 = vpop.permute.xlu1 %832 }
 0x2f5   : > { %v750_v56 = vsel %vm418_vm14, %v747_v51, %v749_v33  ;;  %v751_v57 = vsel %vm418_vm14, %v745_v27, %v747_v51 }
 0x2f6   : > { %v756_v6 = vmul.f32 %v1343_v14, %v751_v57  ;;  %v913_v7 = vpack.c.bf16 %v794_v31, %v750_v56  ;;  %953 = vmatpush1.bf16.msra.mxu0 %v910_v48  ;;  %v930_v48 = vld [vmem:[%s1801_s3] sm:$0xf] }
 0x2f8   : > { %v912_v8 = vpack.c.bf16 %v800_v58, %v756_v6  ;;  %v831_v40 = vpop.permute.xlu0 %830  ;;  %993 = vmatprep.subr.bf16.mxu1 %v913_v7  ;;  %v837_v41 = vpop.permute.xlu1 %836 }
 0x2f9   : > { %v840_v9 = vsel %vm418_vm14, %v831_v40, %v833_v55  ;;  %v841_v10 = vsel %vm418_vm14, %v837_v41, %v831_v40 }
 0x2fa   : > { %v915_v3 = vpack.c.bf16 %v1601_v49, %v840_v9  ;;  %v842_v2 = vmul.f32 %v1353_v17, %v841_v10  ;;  %994 = vmatpush1.bf16.msra.mxu1 %v912_v8  ;;  %v821_v17 = vsel %vm443_vm15, %v1677_v62, %v1675_v61 }
 0x2fc   : > { %v914_v53 = vpack.c.bf16 %v1610_v13, %v842_v2  ;;  %v835_v11 = vpop.permute.xlu0 %834  ;;  %954 = vmatprep.subr.bf16.mxu0 %v915_v3  ;;  %v769_v12 = vpop.permute.xlu1 %768  ;;  %v918_v13 = vpack.c.bf16 %v1638_v21, %v1558_v59  ;;  %v819_v59 = vsel %vm443_vm15, %v1673_v60, %v1679_v63 }
 0x2fd   : > { %v838_v25 = vsel %vm418_vm14, %v835_v11, %v837_v41  ;;  %v839_v0 = vsel %vm418_vm14, %v833_v55, %v835_v11  ;;  %v823_v46 = vmul.f32 %v1347_v16, %v819_v59  ;;  %v1068_v11 = vld [vmem:[%s1300_s10] sm:$0xff] (%p1284_p4) }
 0x2fe   : > { %v844_v52 = vmul.f32 %v1343_v14, %v839_v0  ;;  %v917_v49 = vpack.c.bf16 %v1613_v1, %v838_v25  ;;  %955 = vmatpush1.bf16.msra.mxu0 %v914_v53  ;;  %v825_v1 = vmul.f32 %v1345_v15, %v821_v17  ;;  %v1072_v25 = vld [vmem:[%s1300_s10 + $0x10] sm:$0xff] (%p1284_p4)  ;;  %v1074_v0 = vld [vmem:[%s1300_s10 + $0x18] sm:$0xff] (%p1284_p4)  ;;  %1069 = vst [vmem:[%s1055_s30] sm:$0xff] (%p1284_p4), %v1068_v11 }
 0x2ff   : > { %956 = vmatprep.subr.bf16.mxu0 %v919_v43  ;;  %1073 = vst [vmem:[%s1055_s30 + $0x10] sm:$0xff] (%p1284_p4), %v1072_v25  ;;  %1075 = vst [vmem:[%s1055_s30 + $0x18] sm:$0xff] (%p1284_p4), %v1074_v0 }
 0x300   : > { %v916_v18 = vpack.c.bf16 %v1624_v24, %v844_v52  ;;  %v767_v19 = vpop.permute.xlu0 %766  ;;  %995 = vmatprep.subr.bf16.mxu1 %v917_v49  ;;  %v773_v20 = vpop.permute.xlu1 %772  ;;  %v920_v24 = vpack.c.bf16 %v1650_v22, %v1560_v4  ;;  %v818_v4 = vsel %vm443_vm15, %v1679_v63, %v1677_v62  ;;  %v820_v22 = vsel %vm443_vm15, %v1675_v61, %v1673_v60 }
 0x301   : > { %v777_v14 = vsel %vm443_vm15, %v773_v20, %v767_v19  ;;  %v776_v50 = vsel %vm443_vm15, %v767_v19, %v769_v12 }
 0x302   : > { %v781_v32 = vmul.f32 %v1345_v15, %v777_v14  ;;  %957 = vmatpush1.bf16.msra.mxu0 %v918_v13  ;;  %996 = vmatpush1.bf16.msra.mxu1 %v916_v18  ;;  %v922_v33 = vpack.c.bf16 %v820_v22, %v776_v50 }
 0x303   : > { %997 = vmatprep.subr.bf16.mxu1 %v921_v54 }
 0x304   : > { %v771_v21 = vpop.permute.xlu0 %770  ;;  %v857_v42 = vpop.permute.xlu1 %856  ;;  %v925_v38 = vpack.c.bf16 %v825_v1, %v781_v32 }
 0x305   : > { %v774_v30 = vsel %vm443_vm15, %v771_v21, %v773_v20  ;;  %v775_v34 = vsel %vm443_vm15, %v769_v12, %v771_v21  ;;  %v1070_v12 = vld [vmem:[%s1300_s10 + $0x8] sm:$0xff] (%p1284_p4) }
 0x306   : > { %v779_v23 = vmul.f32 %v1347_v16, %v775_v34  ;;  %998 = vmatpush1.bf16.msra.mxu1 %v920_v24  ;;  %v924_v26 = vpack.c.bf16 %v818_v4, %v774_v30  ;;  %1071 = vst [vmem:[%s1055_s30 + $0x8] sm:$0xff] (%p1284_p4), %v1070_v12 }
 0x307   : > { %999 = vmatprep.subr.bf16.mxu1 %v925_v38 }
 0x308   : > { %v855_v27 = vpop.permute.xlu0 %854  ;;  %v861_v28 = vpop.permute.xlu1 %860  ;;  %v923_v29 = vpack.c.bf16 %v823_v46, %v779_v23 }
 0x309   : > { %v865_v35 = vsel %vm443_vm15, %v861_v28, %v855_v27  ;;  %v864_v62 = vsel %vm443_vm15, %v855_v27, %v857_v42 }
 0x30a   : > { %v869_v36 = vmul.f32 %v1345_v15, %v865_v35  ;;  %958 = vmatprep.subr.bf16.mxu0 %v923_v29  ;;  %1000 = vmatpush1.bf16.msra.mxu1 %v924_v26  ;;  %v926_v39 = vpack.c.bf16 %v864_v62, %v864_v62 }
 0x30b   : > { %959 = vmatpush1.bf16.msra.mxu0 %v922_v33 }
 0x30c   : > { %v929_v63 = vpack.c.bf16 %v869_v36, %v869_v36  ;;  %v859_v37 = vpop.permute.xlu0 %858  ;;  %v941_v51 = vsel %vm611_vm0, %v926_v39, 0 }
 0x30d   : > { %v862_v60 = vsel %vm443_vm15, %v859_v37, %v861_v28  ;;  %v863_v61 = vsel %vm443_vm15, %v857_v42, %v859_v37 }
 0x30e   : > { %v867_v44 = vmul.f32 %v1347_v16, %v863_v61  ;;  %v928_v45 = vpack.c.bf16 %v862_v60, %v862_v60  ;;  %1163 = vmatprep.subr.msk.bf16.mxu1 %vm611_vm0, %v929_v63 }
 0x310   : > { %v927_v15 = vpack.c.bf16 %v867_v44, %v867_v44  ;;  %v947_v47 = vsel %vm611_vm0, %v928_v45, 0 }
 0x311   : > { %1002 = vmatpush1.bf16.msra.mxu1 %v947_v47 }
 0x312   : > { %1161 = vmatprep.subr.msk.bf16.mxu0 %vm611_vm0, %v927_v15 }
 0x313   : > { %961 = vmatpush1.bf16.msra.mxu0 %v941_v51 }
 0x314   : > { %1164 = vmatmul.mubr.msk.bf16.vlgmr.msra.gmra.mrb[4].mxu1 %vm607_vm1, %v930_v48 }
 0x316   : > { %1162 = vmatmul.mubr.msk.bf16.vlgmr.msra.gmra.mrb[4].mxu0 %vm607_vm1, %v930_v48 }
 0x31d   : > { %v935_v5 = vpop.permute.xlu0 %934 }
 0x3e7   : > { %v1027_v16 = vpop.f32.mrb[4].mxu1 }
 0x3e8   : > { %v1028_v55 = vadd.f32 %v1027_v16, %v935_v5  ;;  %v1029_v31 = vpop.f32.mrb[5].mxu1 }
 0x3e9   : > { %v1030_v56 = vadd.f32 %v1029_v31, %v935_v5  ;;  %v986_v57 = vpop.f32.mrb[4].mxu0  ;;  %v1031_v58 = vpop.f32.mrb[6].mxu1  ;;  %1052 = sbr.rel (!%p1284_p4) target bundleno = 1016 (0x3f8), region = 44 }
 0x3ea   : > { %v1036_v6 = vmax.f32 %v1028_v55, 0.0  ;;  %v987_v7 = vadd.f32 %v986_v57, %v935_v5  ;;  %v988_v8 = vpop.f32.mrb[5].mxu0  ;;  %v1032_v40 = vpop.f32.mrb[7].mxu1 }
 0x3eb   : > { %v1037_v41 = vmax.f32 %v1030_v56, 0.0  ;;  %v989_v9 = vadd.f32 %v988_v8, %v935_v5  ;;  %v990_v10 = vpop.f32.mrb[6].mxu0 }
 0x3ec   : > { %1044 = vst [vmem:[%s1300_s10 + $0x30] sm:$0xff] %v1036_v6  ;;  %v1034_v3 = vmax.f32 %v987_v7, 0.0  ;;  %v991_v2 = vpop.f32.mrb[7].mxu0 }
 0x3ed   : > { %1045 = vst [vmem:[%s1300_s10 + $0x38] sm:$0xff] %v1037_v41  ;;  %v1035_v53 = vmax.f32 %v989_v9, 0.0 }
 0x3ee   : > { %1042 = vst [vmem:[%s1300_s10 + $0x20] sm:$0xff] %v1034_v3 }
 0x3ef   : > { %1043 = vst [vmem:[%s1300_s10 + $0x28] sm:$0xff] %v1035_v53 }
 0x3f3   : > { %v1080_v49 = vld [vmem:[%s1300_s10 + $0x30] sm:$0xff] }
 0x3f4   : > { %v1082_v17 = vld [vmem:[%s1300_s10 + $0x38] sm:$0xff]  ;;  %1081 = vst [vmem:[%s1055_s30 + $0x50] sm:$0xff] %v1080_v49 }
 0x3f5   : > { %v1076_v43 = vld [vmem:[%s1300_s10 + $0x20] sm:$0xff]  ;;  %1083 = vst [vmem:[%s1055_s30 + $0x58] sm:$0xff] %v1082_v17 }
 0x3f6   : > { %v1078_v52 = vld [vmem:[%s1300_s10 + $0x28] sm:$0xff]  ;;  %1077 = vst [vmem:[%s1055_s30 + $0x40] sm:$0xff] %v1076_v43 }
 0x3f7   : > { %1079 = vst [vmem:[%s1055_s30 + $0x48] sm:$0xff] %v1078_v52 }
 0x3f8 PF: > { %p12_p8 = scmp.ge.s32.totalorder %s1275_s22, 4   ;;  %s1805_s18 = smov %s1220_s19 }
 0x3f9   : > { %s1806_s19 = smov %s1282_s25  ;;  %s1807_s20 = smov %s1275_s22 }
 0x3fa   :  { %14 = sbr.rel (!%p12_p8) target bundleno = 2 (0x2), region = 93 }

</bundles_post_ra>
